<compile_context>
chip_gen: v7x
topology: tpu7x:2x2x1
jax: 0.10.0
libtpu: 0.0.40
codegen_flags: <defaults>
</compile_context>

<pallas_src>
import jax
import jax.numpy as jnp
from jax.experimental import pallas as pl
from jax.experimental.pallas import tpu as pltpu


def _round_up(x: int, m: int) -> int:
    return ((x + m - 1) // m) * m


def _bilinear_prod_kernel(w_ref, x_ref, o_ref):
    # One MXU matmul per batch tile: W [D, D] @ x_tile [D, TB] -> o_tile [D, TB].
    o_ref[...] = jnp.dot(
        w_ref[...], x_ref[...], preferred_element_type=jnp.float32
    )


def _default_num_tiles() -> int:
    # v7x has 2 TensorCores per chip: split the batch into 2 balanced tiles so
    # dimension_semantics=("parallel",) can shard them across both cores.
    # v5e / v6e have a single TC: one full-batch tile minimizes step overhead.
    try:
        kind = jax.devices()[0].device_kind.lower()
    except Exception:  # pragma: no cover - defensive only
        return 1
    return 2 if any(tag in kind for tag in ("v7", "tpu7", "7x")) else 1


def bilinear_prod(
    W: jax.Array,
    x: jax.Array,
    *,
    compute_dtype=jnp.float32,
    num_tiles: int | None = None,
) -> jax.Array:
    """Computes W @ x with a Pallas TPU kernel.

    W: [D, D], x: [D, B]  ->  returns [D, B] float32.

    compute_dtype: dtype the inputs are fed to the MXU in (f32 default matches
      the PyTorch module; bf16 halves input HBM traffic, accumulation stays f32).
    num_tiles: number of batch tiles (default: 1 on v5e/v6e, 2 on v7x).
    """
    D, D2 = W.shape
    assert D == D2, "W must be square (latent_dim, latent_dim)"
    Dx, B = x.shape
    assert Dx == D, "x first dim must equal latent_dim"

    W = W.astype(compute_dtype)   # no-op if already in compute_dtype
    x = x.astype(compute_dtype)
    out_dtype = jnp.float32

    if num_tiles is None:
        num_tiles = _default_num_tiles()
    num_tiles = max(1, int(num_tiles))

    # Lane-dense batch tile: multiple of 128 lanes, possibly wider than B.
    # Pallas handles the ragged last block (masked writeback), so no host-side
    # pad/slice round trips through HBM are needed.
    tb = max(128, _round_up(pl.cdiv(B, num_tiles), 128))
    grid_b = pl.cdiv(B, tb)

    itm_in = jnp.dtype(compute_dtype).itemsize
    itm_out = jnp.dtype(out_dtype).itemsize

    cost = pl.CostEstimate(
        flops=2 * D * D * B,
        transcendentals=0,
        bytes_accessed=itm_in * (D * D + D * B) + itm_out * D * B,
    )

    # VMEM footprint estimate: double-buffered x / o tiles (+ W counted twice
    # for safety even though its constant index_map fetches it once).
    vmem_need = 2 * (itm_in * D * D + itm_in * D * tb + itm_out * D * tb)
    if vmem_need <= 12 * 1024 * 1024:
        # Fits comfortably under every generation's default scoped VMEM limit
        # (v5e: 16 MiB) -> don't touch the limit at all.
        vmem_limit = None
    else:
        vmem_limit = min(48 * 1024 * 1024, int(vmem_need * 1.5))

    return pl.pallas_call(
        _bilinear_prod_kernel,
        out_shape=jax.ShapeDtypeStruct((D, B), out_dtype),
        grid=(grid_b,),
        in_specs=[
            # W: constant block index -> DMA'd once, stays VMEM-resident.
            pl.BlockSpec((D, D), lambda i: (0, 0)),
            # x: one lane-dense batch tile per grid step.
            pl.BlockSpec((D, tb), lambda i: (0, i)),
        ],
        out_specs=pl.BlockSpec((D, tb), lambda i: (0, i)),
        compiler_params=pltpu.CompilerParams(
            dimension_semantics=("parallel",),  # independent tiles -> megacore
            vmem_limit_bytes=vmem_limit,
        ),
        cost_estimate=cost,
    )(W, x)


if __name__ == "__main__":
    # Small shapes consistent with the module: latent_dim=32, batch=16.
    latent_dim = 32
    batch = 16

    key = jax.random.PRNGKey(0)
    k_w, k_x = jax.random.split(key)

    # Mirrors torch.randn(latent_dim, latent_dim) parameter init.
    W = jax.random.normal(k_w, (latent_dim, latent_dim), dtype=jnp.float32)
    # x of shape (latent_dim, batch), as in CURL's bilinear product.
    x = jax.random.normal(k_x, (latent_dim, batch), dtype=jnp.float32)

    out = jax.block_until_ready(bilinear_prod(W, x))
    ref = W @ x
    assert out.shape == (latent_dim, batch)
    assert jnp.allclose(out, ref, atol=1e-4, rtol=1e-4), "mismatch vs reference"

    # Exercise the multi-tile + ragged-final-block path explicitly
    # (2 tiles of 256 lanes over batch=300; last tile is masked on writeback).
    x_big = jax.random.normal(
        jax.random.PRNGKey(1), (latent_dim, 300), dtype=jnp.float32
    )
    out_big = jax.block_until_ready(bilinear_prod(W, x_big, num_tiles=2))
    assert out_big.shape == (latent_dim, 300)
    assert jnp.allclose(out_big, W @ x_big, atol=1e-4, rtol=1e-4), \
        "mismatch vs reference (ragged multi-tile)"

    print("KERNEL_OK")
</pallas_src>

<mosaic_0001>
module attributes {stable_mosaic.version = 11 : i64} {
  func.func @_bilinear_prod_kernel(%arg0: i32, %arg1: memref<32x32xf32, #tpu.memory_space<vmem>>, %arg2: memref<32x128xf32, #tpu.memory_space<vmem>>, %arg3: memref<32x128xf32, #tpu.memory_space<vmem>>) attributes {dimension_semantics = [#tpu.dimension_semantics<parallel>], iteration_bounds = array<i64: 1>, scalar_prefetch = 0 : i64, scratch_operands = 0 : i64, tpu.core_type = #tpu.core_type<tc>, window_params = [{pipeline_mode = #tpu.pipeline_mode<synchronous>, transform_indices = @transform_0, window_bounds = array<i64: 32, 32>}, {transform_indices = @transform_1, window_bounds = array<i64: 32, 128>}, {transform_indices = @transform_2, window_bounds = array<i64: 32, 128>}]} {
    %c0 = arith.constant 0 : index
    %c0_0 = arith.constant 0 : index
    %0 = vector.load %arg1[%c0, %c0_0] : memref<32x32xf32, #tpu.memory_space<vmem>>, vector<32x32xf32>
    %c0_1 = arith.constant 0 : index
    %c0_2 = arith.constant 0 : index
    %1 = vector.load %arg2[%c0_1, %c0_2] : memref<32x128xf32, #tpu.memory_space<vmem>>, vector<32x128xf32>
    %cst = arith.constant dense<0.000000e+00> : vector<32x128xf32>
    %2 = tpu.matmul %0, %1, %cst {dimension_numbers = #tpu.dot_dimension_numbers<[1], [0], [0], [1], [0, 0, 1, 1], [], []>} : vector<32x32xf32>, vector<32x128xf32>, vector<32x128xf32> -> vector<32x128xf32>
    %c0_3 = arith.constant 0 : index
    %c0_4 = arith.constant 0 : index
    %3 = vector.load %arg3[%c0_3, %c0_4] : memref<32x128xf32, #tpu.memory_space<vmem>>, vector<32x128xf32>
    tpu.vector_store %arg3[%c0_3, %c0_4], %2 {strides = array<i32>} : memref<32x128xf32, #tpu.memory_space<vmem>>, vector<32x128xf32>,
    return
  }
  func.func @transform_0(%arg0: i32) -> (i32, i32) {
    %c0_i32 = arith.constant 0 : i32
    %c0_i32_0 = arith.constant 0 : i32
    %c0_i32_1 = arith.constant 0 : i32
    return %c0_i32, %c0_i32_0 : i32, i32
  }
  func.func @transform_1(%arg0: i32) -> (i32, i32) {
    %c0_i32 = arith.constant 0 : i32
    %c0_i32_0 = arith.constant 0 : i32
    return %c0_i32, %arg0 : i32, i32
  }
  func.func @transform_2(%arg0: i32) -> (i32, i32) {
    %c0_i32 = arith.constant 0 : i32
    %c0_i32_0 = arith.constant 0 : i32
    return %c0_i32, %arg0 : i32, i32
  }
}

</mosaic_0001>

<bundles_post_ra>
// kernel: tpu_custom_call.1
= control target key start
LH: loop header
LB: loop body
LE: loop exit
PB: predicated region body
PF: predicated region fallthrough
CT: control target
= control target key end

     0   :  { %vm19_vm0 = vcmask 261120   ;;  %s218_s1 = inlined_call_operand.vmem [shape: f32[32,16], index: 1, kind: input, shape index: {}]   ;;  %s219_s0 = inlined_call_operand.vmem [shape: f32[32,32], index: 0, kind: input, shape index: {}]   ;;  %s220_s2 = inlined_call_operand.vmem [shape: f32[32,16], index: 2, kind: output, shape index: {}]  }
   0x1   :  { %v15_v0 = vld [vmem:[%s218_s1] sm:$0xff]  ;;  %v16_v1 = vld [vmem:[%s218_s1 + $0x8] sm:$0xff]  ;;  %v17_v2 = vld [vmem:[%s218_s1 + $0x10] sm:$0xff] }
   0x2   :  { %v151_v3 = vpack.c.bf16 %v16_v1, %v15_v0  ;;  %v18_v4 = vld [vmem:[%s218_s1 + $0x18] sm:$0xff]  ;;  %v11_v5 = vld [vmem:[%s219_s0] sm:$0xff]  ;;  %v13_v6 = vld [vmem:[%s219_s0 + $0x10] sm:$0xff] }
   0x3   :  { %v155_v7 = vpack.c.bf16 %v18_v4, %v17_v2  ;;  %145 = vmatprep.mubr.msk.f32.mxu0 %vm19_vm0, %v11_v5  ;;  %148 = vmatprep.mubr.msk.f32.mxu1 %vm19_vm0, %v13_v6  ;;  %v12_v8 = vld [vmem:[%s219_s0 + $0x8] sm:$0xff]  ;;  %v14_v9 = vld [vmem:[%s219_s0 + $0x18] sm:$0xff] }
   0x4   :  { %152 = vmatprep.subr.bf16.mxu0 %v151_v3  ;;  %159 = vmatprep.subr.bf16.mxu1 %v151_v3 }
   0x5   :  { %154 = vmatpush3.bf16.msra.mxu0 %v151_v3  ;;  %161 = vmatpush3.bf16.msra.mxu1 %v151_v3 }
   0x6   :  { %156 = vmatprep.subr.bf16.mxu0 %v155_v7  ;;  %160 = vmatprep.subr.bf16.mxu1 %v155_v7 }
   0x9   :  { %158 = vmatpush3.bf16.msra.mxu0 %v155_v7  ;;  %162 = vmatpush3.bf16.msra.mxu1 %v155_v7 }
   0xc   :  { %146 = vmatmul.mubr.msk.f32.vlgmr.msra.gmra.mrb[0].mxu0 %vm19_vm0, %v12_v8  ;;  %149 = vmatmul.mubr.msk.f32.vlgmr.msra.gmra.mrb[0].mxu1 %vm19_vm0, %v14_v9 }
  0xdf   :  { %v147_v10 = vpop.f32.mrb[0].mxu0  ;;  %v150_v11 = vpop.f32.mrb[0].mxu1 }
  0xe0   :  { %118 = vst [vmem:[%s220_s2 + $0x8] sm:$0xff] %v147_v10  ;;  %120 = vst [vmem:[%s220_s2 + $0x18] sm:$0xff] %v150_v11  ;;  %v98_v12 = vpop.f32.mrb[1].mxu0  ;;  %v108_v13 = vpop.f32.mrb[1].mxu1 }
  0xe1   :  { %117 = vst [vmem:[%s220_s2] sm:$0xff] %v98_v12  ;;  %119 = vst [vmem:[%s220_s2 + $0x10] sm:$0xff] %v108_v13 }

</bundles_post_ra>
